<compile_context>
chip_gen: v6e
topology: v6e:2x2x1
jax: 0.10.0
libtpu: 0.0.40
codegen_flags: <defaults>
</compile_context>

<pallas_src>
import functools

import jax
import jax.numpy as jnp
from jax.experimental import pallas as pl
from jax.experimental.pallas import tpu as pltpu


def _round_up(x, m):
    return ((x + m - 1) // m) * m


def _fit_tile(dim, tile, align):
    """Return (padded_dim, effective_tile) such that effective_tile divides
    padded_dim, effective_tile is a multiple of `align`, and small dims use a
    single full-extent block (no oversized tiles / wasted padding)."""
    dim_aligned = _round_up(dim, align)
    if dim_aligned <= tile:
        return dim_aligned, dim_aligned
    return _round_up(dim, tile), tile


def _linear_kernel_bias(x_ref, w_ref, b_ref, o_ref, acc_ref):
    # x_ref: (tm, tk), w_ref: (tk, tn), b_ref: (1, tn), o_ref: (tm, tn)
    # acc_ref: (tm, tn) f32 accumulator, resident across the k axis.
    k = pl.program_id(2)

    @pl.when(k == 0)
    def _():
        acc_ref[...] = jnp.zeros_like(acc_ref)

    acc_ref[...] += jnp.dot(x_ref[...], w_ref[...],
                            preferred_element_type=jnp.float32)

    @pl.when(k == pl.num_programs(2) - 1)
    def _():
        o_ref[...] = (acc_ref[...] + b_ref[...].astype(jnp.float32)).astype(o_ref.dtype)


def _linear_kernel_nobias(x_ref, w_ref, o_ref, acc_ref):
    k = pl.program_id(2)

    @pl.when(k == 0)
    def _():
        acc_ref[...] = jnp.zeros_like(acc_ref)

    acc_ref[...] += jnp.dot(x_ref[...], w_ref[...],
                            preferred_element_type=jnp.float32)

    @pl.when(k == pl.num_programs(2) - 1)
    def _():
        o_ref[...] = acc_ref[...].astype(o_ref.dtype)


@functools.partial(jax.jit, static_argnames=("tm", "tn", "tk"))
def linear_forward(x, weight, bias=None, *, tm=256, tn=256, tk=512):
    """x: (*, in_features), weight: (out_features, in_features),
    bias: (out_features,) or None. Returns (*, out_features)."""
    orig_shape = x.shape
    K = orig_shape[-1]
    N = weight.shape[0]
    x2 = x.reshape(-1, K)
    M = x2.shape[0]

    # Tile sizing: shrink tiles for small dims, pad only what is required so
    # every block is (8, 128)-aligned and divides the (padded) array evenly.
    M_pad, tm_e = _fit_tile(M, tm, 8)
    N_pad, tn_e = _fit_tile(N, tn, 128)
    K_pad, tk_e = _fit_tile(K, tk, 128)

    # One-time transpose outside the kernel: MXU RHS becomes (K, N).
    wt = weight.T

    if (M_pad, K_pad) != (M, K):
        x2 = jnp.pad(x2, ((0, M_pad - M), (0, K_pad - K)))
    if (K_pad, N_pad) != (K, N):
        wt = jnp.pad(wt, ((0, K_pad - K), (0, N_pad - N)))

    grid = (M_pad // tm_e, N_pad // tn_e, K_pad // tk_e)

    x_spec = pl.BlockSpec((tm_e, tk_e), lambda i, j, k: (i, k))
    w_spec = pl.BlockSpec((tk_e, tn_e), lambda i, j, k: (k, j))
    o_spec = pl.BlockSpec((tm_e, tn_e), lambda i, j, k: (i, j))

    itemsize = jnp.dtype(x.dtype).itemsize
    vmem_est = (
        2 * (tm_e * tk_e + tk_e * tn_e) * itemsize   # double-buffered inputs
        + 2 * tm_e * tn_e * itemsize                 # double-buffered output
        + tm_e * tn_e * 4                            # f32 accumulator scratch
        + 2 * tn_e * itemsize                        # bias tile
    )
    vmem_limit = int(min(max(2 * vmem_est, 4 * 1024 * 1024), 32 * 1024 * 1024))

    cparams = pltpu.CompilerParams(
        dimension_semantics=("parallel", "parallel", "arbitrary"),
        vmem_limit_bytes=vmem_limit,
    )
    out_shape = jax.ShapeDtypeStruct((M_pad, N_pad), x.dtype)
    scratch = [pltpu.VMEM((tm_e, tn_e), jnp.float32)]

    if bias is not None:
        b2 = bias.reshape(1, N)
        if N_pad != N:
            b2 = jnp.pad(b2, ((0, 0), (0, N_pad - N)))
        b_spec = pl.BlockSpec((1, tn_e), lambda i, j, k: (0, j))
        out = pl.pallas_call(
            _linear_kernel_bias,
            out_shape=out_shape,
            grid_spec=pltpu.PrefetchScalarGridSpec(
                num_scalar_prefetch=0,
                grid=grid,
                in_specs=[x_spec, w_spec, b_spec],
                out_specs=o_spec,
                scratch_shapes=scratch,
            ),
            compiler_params=cparams,
        )(x2, wt, b2)
    else:
        out = pl.pallas_call(
            _linear_kernel_nobias,
            out_shape=out_shape,
            grid_spec=pltpu.PrefetchScalarGridSpec(
                num_scalar_prefetch=0,
                grid=grid,
                in_specs=[x_spec, w_spec],
                out_specs=o_spec,
                scratch_shapes=scratch,
            ),
            compiler_params=cparams,
        )(x2, wt)

    out = out[:M, :N]
    return out.reshape(*orig_shape[:-1], N)


def init_linear_params(key, in_features, out_features, bias=True, dtype=jnp.float32):
    """Deterministic init mirroring the PyTorch module: (randn * 2 - 1) / sqrt(in_features)."""
    kw, kb = jax.random.split(key)
    scale = 1.0 / jnp.sqrt(jnp.asarray(in_features, dtype))
    weight = (jax.random.normal(kw, (out_features, in_features), dtype) * 2.0 - 1.0) * scale
    b = None
    if bias:
        b = (jax.random.normal(kb, (out_features,), dtype) * 2.0 - 1.0) * scale
    return weight, b


if __name__ == "__main__":
    key = jax.random.PRNGKey(0)
    k_x, k_p = jax.random.split(key)

    # Small demo shapes consistent with the module's forward: (*, in_features).
    batch, seq, in_features, out_features = 2, 8, 32, 16
    x = jax.random.normal(k_x, (batch, seq, in_features), jnp.float32)
    weight, bias = init_linear_params(k_p, in_features, out_features, bias=True)

    y = linear_forward(x, weight, bias)
    jax.block_until_ready(y)

    y_ref = x @ weight.T + bias
    assert y.shape == (batch, seq, out_features)
    assert jnp.allclose(y, y_ref, atol=1e-5, rtol=1e-5)

    # Bias-free path.
    y_nb = linear_forward(x, weight, None)
    jax.block_until_ready(y_nb)
    assert jnp.allclose(y_nb, x @ weight.T, atol=1e-5, rtol=1e-5)

    # Irregular shapes + small tiles to exercise padding and the multi-tile
    # (i, j, k) accumulation path (grid = (2, 2, 2)), while staying small.
    x3 = jax.random.normal(jax.random.PRNGKey(1), (3, 20, 160), jnp.float32)
    w3, b3 = init_linear_params(jax.random.PRNGKey(2), 160, 200, bias=True)
    y3 = linear_forward(x3, w3, b3, tm=32, tn=128, tk=128)
    jax.block_until_ready(y3)
    assert y3.shape == (3, 20, 200)
    assert jnp.allclose(y3, x3 @ w3.T + b3, atol=1e-4, rtol=1e-4)

    print("KERNEL_OK")
</pallas_src>

<mosaic_0001>
module attributes {stable_mosaic.version = 11 : i64} {
  func.func @_linear_kernel_bias(%arg0: i32, %arg1: i32, %arg2: i32, %arg3: memref<16x128xf32, #tpu.memory_space<vmem>>, %arg4: memref<128x128xf32, #tpu.memory_space<vmem>>, %arg5: memref<1x128xf32, #tpu.memory_space<vmem>>, %arg6: memref<16x128xf32, #tpu.memory_space<vmem>>, %arg7: memref<16x128xf32, #tpu.memory_space<vmem>>) attributes {dimension_semantics = [#tpu.dimension_semantics<parallel>, #tpu.dimension_semantics<parallel>, #tpu.dimension_semantics<arbitrary>], iteration_bounds = array<i64: 1, 1, 1>, scalar_prefetch = 0 : i64, scratch_operands = 1 : i64, tpu.core_type = #tpu.core_type<tc>, window_params = [{transform_indices = @transform_0, window_bounds = array<i64: 16, 128>}, {transform_indices = @transform_1, window_bounds = array<i64: 128, 128>}, {transform_indices = @transform_2, window_bounds = array<i64: 1, 128>}, {transform_indices = @transform_3, window_bounds = array<i64: 16, 128>}]} {
    %c0_i32 = arith.constant 0 : i32
    %0 = arith.cmpi eq, %arg2, %c0_i32 : i32
    %1 = arith.extui %0 : i1 to i32
    %c0_i32_0 = arith.constant 0 : i32
    %2 = arith.cmpi ne, %1, %c0_i32_0 : i32
    scf.if %2 {
      %cst_10 = arith.constant 0.000000e+00 : f32
      %12 = vector.broadcast %cst_10 : f32 to vector<16x128xf32>
      %c0_11 = arith.constant 0 : index
      %c0_12 = arith.constant 0 : index
      %13 = vector.load %arg7[%c0_11, %c0_12] : memref<16x128xf32, #tpu.memory_space<vmem>>, vector<16x128xf32>
      tpu.vector_store %arg7[%c0_11, %c0_12], %12 {strides = array<i32>} : memref<16x128xf32, #tpu.memory_space<vmem>>, vector<16x128xf32>,
    } else {
    }
    %c0 = arith.constant 0 : index
    %c0_1 = arith.constant 0 : index
    %3 = vector.load %arg7[%c0, %c0_1] : memref<16x128xf32, #tpu.memory_space<vmem>>, vector<16x128xf32>
    %c0_2 = arith.constant 0 : index
    %c0_3 = arith.constant 0 : index
    %4 = vector.load %arg3[%c0_2, %c0_3] : memref<16x128xf32, #tpu.memory_space<vmem>>, vector<16x128xf32>
    %c0_4 = arith.constant 0 : index
    %c0_5 = arith.constant 0 : index
    %5 = vector.load %arg4[%c0_4, %c0_5] : memref<128x128xf32, #tpu.memory_space<vmem>>, vector<128x128xf32>
    %cst = arith.constant dense<0.000000e+00> : vector<16x128xf32>
    %6 = tpu.matmul %4, %5, %cst {dimension_numbers = #tpu.dot_dimension_numbers<[1], [0], [0], [1], [0, 0, 1, 1], [], []>} : vector<16x128xf32>, vector<128x128xf32>, vector<16x128xf32> -> vector<16x128xf32>
    %7 = arith.addf %3, %6 : vector<16x128xf32>
    %c0_6 = arith.constant 0 : index
    %c0_7 = arith.constant 0 : index
    %8 = vector.load %arg7[%c0_6, %c0_7] : memref<16x128xf32, #tpu.memory_space<vmem>>, vector<16x128xf32>
    tpu.vector_store %arg7[%c0_6, %c0_7], %7 {strides = array<i32>} : memref<16x128xf32, #tpu.memory_space<vmem>>, vector<16x128xf32>,
    %c0_i32_8 = arith.constant 0 : i32
    %9 = arith.cmpi eq, %arg2, %c0_i32_8 : i32
    %10 = arith.extui %9 : i1 to i32
    %c0_i32_9 = arith.constant 0 : i32
    %11 = arith.cmpi ne, %10, %c0_i32_9 : i32
    scf.if %11 {
      %c0_10 = arith.constant 0 : index
      %c0_11 = arith.constant 0 : index
      %12 = vector.load %arg7[%c0_10, %c0_11] : memref<16x128xf32, #tpu.memory_space<vmem>>, vector<16x128xf32>
      %c0_12 = arith.constant 0 : index
      %c0_13 = arith.constant 0 : index
      %13 = vector.load %arg5[%c0_12, %c0_13] : memref<1x128xf32, #tpu.memory_space<vmem>>, vector<1x128xf32>
      %14 = vector.broadcast %13 : vector<1x128xf32> to vector<16x128xf32>
      %15 = arith.addf %12, %14 : vector<16x128xf32>
      %c0_14 = arith.constant 0 : index
      %c0_15 = arith.constant 0 : index
      %16 = vector.load %arg6[%c0_14, %c0_15] : memref<16x128xf32, #tpu.memory_space<vmem>>, vector<16x128xf32>
      tpu.vector_store %arg6[%c0_14, %c0_15], %15 {strides = array<i32>} : memref<16x128xf32, #tpu.memory_space<vmem>>, vector<16x128xf32>,
    } else {
    }
    return
  }
  func.func @transform_0(%arg0: i32, %arg1: i32, %arg2: i32) -> (i32, i32) {
    %c0_i32 = arith.constant 0 : i32
    return %arg0, %arg2 : i32, i32
  }
  func.func @transform_1(%arg0: i32, %arg1: i32, %arg2: i32) -> (i32, i32) {
    %c0_i32 = arith.constant 0 : i32
    return %arg2, %arg1 : i32, i32
  }
  func.func @transform_2(%arg0: i32, %arg1: i32, %arg2: i32) -> (i32, i32) {
    %c0_i32 = arith.constant 0 : i32
    %c0_i32_0 = arith.constant 0 : i32
    return %c0_i32, %arg1 : i32, i32
  }
  func.func @transform_3(%arg0: i32, %arg1: i32, %arg2: i32) -> (i32, i32) {
    %c0_i32 = arith.constant 0 : i32
    return %arg0, %arg1 : i32, i32
  }
}

</mosaic_0001>

<bundles_post_ra>
// kernel: linear_forward.1
= control target key start
LH: loop header
LB: loop body
LE: loop exit
PB: predicated region body
PF: predicated region fallthrough
CT: control target
= control target key end

     0   :  { %s276_s1 = inlined_call_operand.vmem [shape: f32[128,128], index: 1, kind: input, shape index: {}]   ;;  %s277_s0 = inlined_call_operand.vmem [shape: f32[16,128], index: 0, kind: input, shape index: {}]   ;;  %s278_s2 = inlined_call_operand.vmem [shape: f32[1,128], index: 2, kind: input, shape index: {}]   ;;  %s279_s3 = inlined_call_operand.vmem [shape: f32[16,128], index: 3, kind: output, shape index: {}]  }
   0x1   :  { %v39_v0 = vld [vmem:[%s276_s1 + $0x78] sm:$0xff]  ;;  %v38_v1 = vld [vmem:[%s276_s1 + $0x70] sm:$0xff]  ;;  %v37_v2 = vld [vmem:[%s276_s1 + $0x68] sm:$0xff] }
   0x2   :  { %158 = vmatprep.subr.mxu0 %v39_v0  ;;  %v36_v3 = vld [vmem:[%s276_s1 + $0x60] sm:$0xff]  ;;  %v35_v5 = vld [vmem:[%s276_s1 + $0x58] sm:$0xff]  ;;  %v34_v6 = vld [vmem:[%s276_s1 + $0x50] sm:$0xff] }
   0x3   :  { %159 = vmatpush3.msra.mxu0 %v39_v0  ;;  %v22_v4 = vld [vmem:[%s277_s0] sm:$0xff]  ;;  %v33_v7 = vld [vmem:[%s276_s1 + $0x48] sm:$0xff]  ;;  %v31_v9 = vld [vmem:[%s276_s1 + $0x38] sm:$0xff] }
   0x4   :  { %160 = vmatprep.subr.mxu0 %v38_v1  ;;  %190 = vmatprep.mubr.f32.mxu0 %v22_v4  ;;  %v32_v8 = vld [vmem:[%s276_s1 + $0x40] sm:$0xff]  ;;  %v30_v10 = vld [vmem:[%s276_s1 + $0x30] sm:$0xff]  ;;  %v29_v11 = vld [vmem:[%s276_s1 + $0x28] sm:$0xff] }
   0x5   :  { %161 = vmatpush3.msra.mxu0 %v38_v1  ;;  %v28_v12 = vld [vmem:[%s276_s1 + $0x20] sm:$0xff]  ;;  %v27_v13 = vld [vmem:[%s276_s1 + $0x18] sm:$0xff]  ;;  %v26_v14 = vld [vmem:[%s276_s1 + $0x10] sm:$0xff] }
   0x6   :  { %162 = vmatprep.subr.mxu0 %v37_v2  ;;  %v25_v15 = vld [vmem:[%s276_s1 + $0x8] sm:$0xff]  ;;  %v24_v16 = vld [vmem:[%s276_s1] sm:$0xff] }
   0x7   :  { %163 = vmatpush3.msra.mxu0 %v37_v2  ;;  %v23_v17 = vld [vmem:[%s277_s0 + $0x8] sm:$0xff]  ;;  %v139_v18 = vld [vmem:[%s278_s2] ss:$0 sm:$0xff] }
   0x8   :  { %164 = vmatprep.subr.mxu0 %v36_v3 }
   0x9   :  { %165 = vmatpush3.msra.mxu0 %v36_v3 }
   0xa   :  { %166 = vmatprep.subr.mxu0 %v35_v5 }
   0xb   :  { %167 = vmatpush3.msra.mxu0 %v35_v5 }
   0xc   :  { %168 = vmatprep.subr.mxu0 %v34_v6 }
   0xd   :  { %169 = vmatpush3.msra.mxu0 %v34_v6 }
   0xe   :  { %170 = vmatprep.subr.mxu0 %v33_v7 }
   0xf   :  { %171 = vmatpush3.msra.mxu0 %v33_v7 }
  0x10   :  { %172 = vmatprep.subr.mxu0 %v32_v8 }
  0x11   :  { %173 = vmatpush3.msra.mxu0 %v32_v8 }
  0x12   :  { %174 = vmatprep.subr.mxu0 %v31_v9 }
  0x13   :  { %175 = vmatpush3.msra.mxu0 %v31_v9 }
  0x14   :  { %176 = vmatprep.subr.mxu0 %v30_v10 }
  0x15   :  { %177 = vmatpush3.msra.mxu0 %v30_v10 }
  0x16   :  { %178 = vmatprep.subr.mxu0 %v29_v11 }
  0x17   :  { %179 = vmatpush3.msra.mxu0 %v29_v11 }
  0x18   :  { %180 = vmatprep.subr.mxu0 %v28_v12 }
  0x19   :  { %181 = vmatpush3.msra.mxu0 %v28_v12 }
  0x1a   :  { %182 = vmatprep.subr.mxu0 %v27_v13 }
  0x1b   :  { %183 = vmatpush3.msra.mxu0 %v27_v13 }
  0x1c   :  { %184 = vmatprep.subr.mxu0 %v26_v14 }
  0x1d   :  { %185 = vmatpush3.msra.mxu0 %v26_v14 }
  0x1e   :  { %186 = vmatprep.subr.mxu0 %v25_v15 }
  0x1f   :  { %187 = vmatpush3.msra.mxu0 %v25_v15 }
  0x20   :  { %188 = vmatprep.subr.mxu0 %v24_v16 }
  0x21   :  { %189 = vmatpush3.msra.mxu0 %v24_v16 }
  0x22   :  { %191 = vmatmul.mubr.f32.vlgmr.msra.gmra.mxu0 %v23_v17 }
  0xe2   :  { %v192_v19 = vpop.f32.mrf.mxu0 }
  0xe3   :  { %v132_v20 = vadd.f32 %v192_v19, %v139_v18 }
  0xe4   :  { %v106_v21 = vpop.f32.mrf.mxu0 }
  0xe5   :  { %134 = vst [vmem:[%s279_s3 + $0x8] sm:$0xff] %v132_v20  ;;  %v131_v22 = vadd.f32 %v139_v18, %v106_v21 }
  0xe7   :  { %133 = vst [vmem:[%s279_s3] sm:$0xff] %v131_v22 }

</bundles_post_ra>
